<compile_context>
chip_gen: v5e
topology: v5e:2x2
jax: 0.10.0
libtpu: 0.0.40
codegen_flags: <defaults>
</compile_context>

<pallas_src>
import math

import jax
import jax.numpy as jnp
from jax.experimental import pallas as pl
from jax.experimental.pallas import tpu as pltpu


def _make_transition_kernel(needs_mask, total_in_pixels, tin, bn_in_f32):
    """Kernel factory (static config baked in via closure).

    Block shapes seen by the kernel:
      x_ref:    (1, Cin, TIN)    flattened input pixels (whole input rows)
      bn_ref:   (Cin, 2)         [:,0] = folded BN scale, [:,1] = folded shift
      pool_ref: (TIN, TOUT)      two-hot 0.25 average-pooling matrix
      w_ref:    (Cout, Cin)      1x1 conv weight
      b_ref:    (Cout, 1)        conv bias (f32)
      o_ref:    (1, Cout, TOUT)  flattened output pixels (whole output rows)
    """

    def kernel(x_ref, bn_ref, pool_ref, w_ref, b_ref, o_ref):
        x = x_ref[0]                                           # (Cin, TIN)
        if bn_in_f32:
            x = x.astype(jnp.float32)
        scale = bn_ref[:, 0:1].astype(x.dtype)                 # (Cin, 1)
        shift = bn_ref[:, 1:2].astype(x.dtype)                 # (Cin, 1)
        # BatchNorm (inference, folded) + ReLU.
        h = jnp.maximum(x * scale + shift, 0)                  # (Cin, TIN)

        if needs_mask:
            # Partial tail block: zero out-of-bounds lanes so stale VMEM
            # (possibly NaN/Inf) cannot pollute valid outputs through the
            # pooling matmul (0 * NaN = NaN otherwise).
            t = pl.program_id(1)
            lane = jax.lax.broadcasted_iota(jnp.int32, (1, tin), 1)
            valid = total_in_pixels - t * tin
            h = jnp.where(lane < valid, h, 0)

        # 2x2 average pool as an MXU matmul with the two-hot 0.25 matrix.
        pooled = jnp.dot(h.astype(pool_ref.dtype), pool_ref[...],
                         preferred_element_type=jnp.float32)   # (Cin, TOUT)
        # 1x1 conv == channel matmul; bias added after pooling (commutes).
        y = jnp.dot(w_ref[...], pooled.astype(w_ref.dtype),
                    preferred_element_type=jnp.float32)        # (Cout, TOUT)
        y = y + b_ref[...]
        o_ref[0] = y.astype(o_ref.dtype)

    return kernel


def _pick_rows_per_tile(ho, wo, cap=512):
    """Output rows per pixel tile.

    Small maps: one tile per image (block dims == full dims -> always legal).
    Large maps: smallest row count making TOUT = k*Wo a multiple of 128 lanes
    (scaled up toward `cap`); the tail block (if any) is masked in-kernel.
    """
    if ho * wo <= cap:
        return ho
    k_unit = 128 // math.gcd(wo, 128)          # smallest k with (k*Wo) % 128 == 0
    k = k_unit * max(1, cap // (k_unit * wo))
    return ho if k >= ho else k


def _pooling_matrix(rows_per_tile, wo, dtype):
    """(TIN, TOUT) matrix: column q has 0.25 at the 4 input pixels of window q."""
    w2 = 2 * wo
    tin = 2 * rows_per_tile * w2
    tout = rows_per_tile * wo
    p = jnp.arange(tin)
    ri = p // w2                                # input row within tile
    ci = p % w2                                 # input col
    qo = (ri // 2) * wo + (ci // 2)             # output pixel each input feeds
    onehot = (qo[:, None] == jnp.arange(tout)[None, :]).astype(jnp.float32)
    return (onehot * 0.25).astype(dtype)


def transition_block(x_nchw, gamma, beta, running_mean, running_var,
                     conv_w, conv_b, *, eps=1e-5, compute_dtype=None,
                     bn_in_f32=True):
    """Pallas TransitionBlock forward. x_nchw: (N, Cin, H, W)."""
    N, Cin, H, W = x_nchw.shape
    Cout = conv_w.shape[0]
    assert H >= 2 and W >= 2, "AvgPool2d(2) needs spatial dims >= 2"
    Ho, Wo = H // 2, W // 2
    H2, W2 = 2 * Ho, 2 * Wo
    P_out = Ho * Wo
    P_in = H2 * W2
    out_dtype = x_nchw.dtype
    cd = out_dtype if compute_dtype is None else compute_dtype
    f32 = jnp.float32

    # AvgPool2d(2) floor-truncates odd spatial dims (no padding) — match that.
    if (H2, W2) != (H, W):
        x_nchw = x_nchw[:, :, :H2, :W2]
    # Free (layout-preserving) reshape: pixels flattened onto the lane axis.
    x_flat = x_nchw.reshape(N, Cin, P_in)
    if x_flat.dtype != cd:
        x_flat = x_flat.astype(cd)

    # Fold eval-mode BN into per-channel scale/shift, packed into one array.
    inv_std = jax.lax.rsqrt(running_var.astype(f32) + eps)
    scale = gamma.astype(f32) * inv_std
    shift = beta.astype(f32) - running_mean.astype(f32) * scale
    bn = jnp.stack([scale, shift], axis=1)                     # (Cin, 2)

    w = conv_w.reshape(Cout, Cin).astype(cd)
    b = conv_b.reshape(Cout, 1).astype(f32)

    # Pixel tiling (whole output rows per tile).
    k = _pick_rows_per_tile(Ho, Wo)
    TOUT = k * Wo
    TIN = 4 * TOUT
    num_tiles = (Ho + k - 1) // k
    needs_mask = (Ho % k) != 0
    pool = _pooling_matrix(k, Wo, cd)                          # (TIN, TOUT)

    kernel = _make_transition_kernel(needs_mask, P_in, TIN,
                                     bn_in_f32 or cd == f32)

    # Advisory cost estimate (true HBM traffic: x once in, out once out).
    cdsz = jnp.dtype(cd).itemsize
    outsz = jnp.dtype(out_dtype).itemsize
    flops = int(N * (3 * Cin * P_in                       # BN + ReLU
                     + num_tiles * 2 * Cin * TIN * TOUT   # pooling matmul
                     + 2 * Cout * Cin * P_out             # 1x1 conv matmul
                     + Cout * P_out))                     # bias add
    bytes_accessed = int(N * (Cin * P_in * cdsz + Cout * P_out * outsz)
                         + TIN * TOUT * cdsz + Cout * Cin * cdsz
                         + Cin * 2 * 4 + Cout * 4)
    cost = pl.CostEstimate(flops=flops, transcendentals=0,
                           bytes_accessed=bytes_accessed)

    # VMEM budget from actual block sizes; clamp to [32 MiB, 80 MiB] so
    # realistic shapes fit v7x's 64 MiB while v5e/v6e can exceed the 32 MiB
    # scoped default.
    vmem_est = (2 * Cin * TIN * cdsz                  # x (double-buffered)
                + 2 * Cout * TOUT * outsz             # out
                + 2 * TIN * TOUT * cdsz               # pool matrix
                + 2 * Cout * Cin * cdsz               # conv weight
                + 2 * (Cin + Cout) * 128 * 4          # bn + bias (lane-padded)
                + (Cin * TIN + Cin * TOUT + Cout * TOUT) * 4)  # f32 temps
    vmem_limit = max(32 << 20, min(vmem_est * 3 // 2 + (4 << 20), 80 << 20))

    grid = (N, num_tiles)

    out_flat = pl.pallas_call(
        kernel,
        out_shape=jax.ShapeDtypeStruct((N, Cout, P_out), out_dtype),
        grid_spec=pltpu.PrefetchScalarGridSpec(
            num_scalar_prefetch=0,
            grid=grid,
            in_specs=[
                pl.BlockSpec((1, Cin, TIN), lambda n, t: (n, 0, t)),
                pl.BlockSpec((Cin, 2), lambda n, t: (0, 0)),
                pl.BlockSpec((TIN, TOUT), lambda n, t: (0, 0)),
                pl.BlockSpec((Cout, Cin), lambda n, t: (0, 0)),
                pl.BlockSpec((Cout, 1), lambda n, t: (0, 0)),
            ],
            out_specs=pl.BlockSpec((1, Cout, TOUT), lambda n, t: (n, 0, t)),
        ),
        compiler_params=pltpu.CompilerParams(
            dimension_semantics=("parallel", "parallel"),
            vmem_limit_bytes=int(vmem_limit),
        ),
        cost_estimate=cost,
    )(x_flat, bn, pool, w, b)

    # (N, Cout, Ho*Wo) is already NCHW-flattened — free reshape, no transpose.
    return out_flat.reshape(N, Cout, Ho, Wo)


def _reference(x, gamma, beta, mean, var, conv_w, conv_b, eps=1e-5):
    """Pure-JAX reference of the PyTorch forward (eval-mode BN)."""
    N, Cin, H, W = x.shape
    Cout = conv_w.shape[0]
    xn = (x - mean[None, :, None, None]) / jnp.sqrt(var[None, :, None, None] + eps)
    xn = xn * gamma[None, :, None, None] + beta[None, :, None, None]
    h = jnp.maximum(xn, 0.0)
    y = jnp.einsum('nchw,oc->nohw', h, conv_w.reshape(Cout, Cin)) \
        + conv_b[None, :, None, None]
    yp = y.reshape(N, Cout, H // 2, 2, W // 2, 2).mean(axis=(3, 5))
    return yp


if __name__ == "__main__":
    key = jax.random.PRNGKey(0)
    N, Cin, H, W = 2, 4, 16, 16
    compression = 0.5
    Cout = int(Cin * compression)

    ks = jax.random.split(key, 8)
    x = jax.random.normal(ks[0], (N, Cin, H, W), dtype=jnp.float32)

    gamma = jax.random.uniform(ks[1], (Cin,), minval=0.5, maxval=1.5, dtype=jnp.float32)
    beta = jax.random.normal(ks[2], (Cin,), dtype=jnp.float32) * 0.1
    running_mean = jax.random.normal(ks[3], (Cin,), dtype=jnp.float32) * 0.1
    running_var = jax.random.uniform(ks[4], (Cin,), minval=0.5, maxval=1.5, dtype=jnp.float32)

    # PyTorch conv weight layout: (Cout, Cin, 1, 1)
    conv_w = jax.random.normal(ks[5], (Cout, Cin, 1, 1), dtype=jnp.float32) * 0.2
    conv_b = jax.random.normal(ks[6], (Cout,), dtype=jnp.float32) * 0.1

    ref = _reference(x, gamma, beta, running_mean, running_var, conv_w, conv_b)

    # f32 path: tight match vs. reference.
    out = transition_block(x, gamma, beta, running_mean, running_var, conv_w, conv_b)
    out = jax.block_until_ready(out)
    assert out.shape == (N, Cout, H // 2, W // 2), out.shape
    assert jnp.allclose(out, ref, atol=1e-4, rtol=1e-4), "f32 mismatch vs reference"

    # bf16 storage path (halves HBM traffic; recommended default on v5e).
    out_bf16 = transition_block(x, gamma, beta, running_mean, running_var,
                                conv_w, conv_b, compute_dtype=jnp.bfloat16)
    out_bf16 = jax.block_until_ready(out_bf16)
    assert jnp.allclose(out_bf16.astype(jnp.float32), ref, atol=7e-2, rtol=7e-2), \
        "bf16 mismatch vs reference"

    print("KERNEL_OK")
</pallas_src>

<mosaic_0001>
module attributes {stable_mosaic.version = 11 : i64} {
  func.func @kernel(%arg0: i32, %arg1: i32, %arg2: memref<1x4x256xf32, #tpu.memory_space<vmem>>, %arg3: memref<4x2xf32, #tpu.memory_space<vmem>>, %arg4: memref<256x64xf32, #tpu.memory_space<vmem>>, %arg5: memref<2x4xf32, #tpu.memory_space<vmem>>, %arg6: memref<2x1xf32, #tpu.memory_space<vmem>>, %arg7: memref<1x2x64xf32, #tpu.memory_space<vmem>>) attributes {dimension_semantics = [#tpu.dimension_semantics<parallel>, #tpu.dimension_semantics<parallel>], iteration_bounds = array<i64: 2, 1>, scalar_prefetch = 0 : i64, scratch_operands = 0 : i64, tpu.core_type = #tpu.core_type<tc>, window_params = [{transform_indices = @transform_0, window_bounds = array<i64: 1, 4, 256>}, {pipeline_mode = #tpu.pipeline_mode<synchronous>, transform_indices = @transform_1, window_bounds = array<i64: 4, 2>}, {pipeline_mode = #tpu.pipeline_mode<synchronous>, transform_indices = @transform_2, window_bounds = array<i64: 256, 64>}, {pipeline_mode = #tpu.pipeline_mode<synchronous>, transform_indices = @transform_3, window_bounds = array<i64: 2, 4>}, {pipeline_mode = #tpu.pipeline_mode<synchronous>, transform_indices = @transform_4, window_bounds = array<i64: 2, 1>}, {transform_indices = @transform_5, window_bounds = array<i64: 1, 2, 64>}]} {
    %c0 = arith.constant 0 : index
    %c0_0 = arith.constant 0 : index
    %c0_1 = arith.constant 0 : index
    %0 = vector.load %arg2[%c0, %c0_0, %c0_1] : memref<1x4x256xf32, #tpu.memory_space<vmem>>, vector<1x4x256xf32>
    %1 = vector.shape_cast %0 : vector<1x4x256xf32> to vector<4x256xf32>
    %c0_2 = arith.constant 0 : index
    %c0_3 = arith.constant 0 : index
    %2 = vector.load %arg3[%c0_2, %c0_3] : memref<4x2xf32, #tpu.memory_space<vmem>>, vector<4x1xf32>
    %c0_4 = arith.constant 0 : index
    %c1 = arith.constant 1 : index
    %3 = vector.load %arg3[%c0_4, %c1] : memref<4x2xf32, #tpu.memory_space<vmem>>, vector<4x1xf32>
    %4 = vector.broadcast %2 : vector<4x1xf32> to vector<4x256xf32>
    %5 = arith.mulf %1, %4 : vector<4x256xf32>
    %6 = vector.broadcast %3 : vector<4x1xf32> to vector<4x256xf32>
    %7 = arith.addf %5, %6 : vector<4x256xf32>
    %cst = arith.constant 0.000000e+00 : f32
    %8 = vector.broadcast %cst : f32 to vector<4x256xf32>
    %9 = arith.maximumf %7, %8 : vector<4x256xf32>
    %c0_5 = arith.constant 0 : index
    %c0_6 = arith.constant 0 : index
    %10 = vector.load %arg4[%c0_5, %c0_6] : memref<256x64xf32, #tpu.memory_space<vmem>>, vector<256x64xf32>
    %cst_7 = arith.constant dense<0.000000e+00> : vector<4x64xf32>
    %11 = tpu.matmul %9, %10, %cst_7 {dimension_numbers = #tpu.dot_dimension_numbers<[1], [0], [0], [1], [0, 0, 1, 1], [], []>} : vector<4x256xf32>, vector<256x64xf32>, vector<4x64xf32> -> vector<4x64xf32>
    %c0_8 = arith.constant 0 : index
    %c0_9 = arith.constant 0 : index
    %12 = vector.load %arg5[%c0_8, %c0_9] : memref<2x4xf32, #tpu.memory_space<vmem>>, vector<2x4xf32>
    %cst_10 = arith.constant dense<0.000000e+00> : vector<2x64xf32>
    %13 = tpu.matmul %12, %11, %cst_10 {dimension_numbers = #tpu.dot_dimension_numbers<[1], [0], [0], [1], [0, 0, 1, 1], [], []>} : vector<2x4xf32>, vector<4x64xf32>, vector<2x64xf32> -> vector<2x64xf32>
    %c0_11 = arith.constant 0 : index
    %c0_12 = arith.constant 0 : index
    %14 = vector.load %arg6[%c0_11, %c0_12] : memref<2x1xf32, #tpu.memory_space<vmem>>, vector<2x1xf32>
    %15 = vector.broadcast %14 : vector<2x1xf32> to vector<2x64xf32>
    %16 = arith.addf %13, %15 : vector<2x64xf32>
    %c0_13 = arith.constant 0 : index
    %c0_14 = arith.constant 0 : index
    %c0_15 = arith.constant 0 : index
    %17 = vector.load %arg7[%c0_13, %c0_14, %c0_15] : memref<1x2x64xf32, #tpu.memory_space<vmem>>, vector<1x2x64xf32>
    %18 = vector.shape_cast %17 : vector<1x2x64xf32> to vector<2x64xf32>
    %19 = vector.shape_cast %16 : vector<2x64xf32> to vector<1x2x64xf32>
    tpu.vector_store %arg7[%c0_13, %c0_14, %c0_15], %19 {strides = array<i32>} : memref<1x2x64xf32, #tpu.memory_space<vmem>>, vector<1x2x64xf32>,
    return
  }
  func.func @transform_0(%arg0: i32, %arg1: i32) -> (i32, i32, i32) {
    %c0_i32 = arith.constant 0 : i32
    %c0_i32_0 = arith.constant 0 : i32
    return %arg0, %c0_i32, %arg1 : i32, i32, i32
  }
  func.func @transform_1(%arg0: i32, %arg1: i32) -> (i32, i32) {
    %c0_i32 = arith.constant 0 : i32
    %c0_i32_0 = arith.constant 0 : i32
    %c0_i32_1 = arith.constant 0 : i32
    return %c0_i32, %c0_i32_0 : i32, i32
  }
  func.func @transform_2(%arg0: i32, %arg1: i32) -> (i32, i32) {
    %c0_i32 = arith.constant 0 : i32
    %c0_i32_0 = arith.constant 0 : i32
    %c0_i32_1 = arith.constant 0 : i32
    return %c0_i32, %c0_i32_0 : i32, i32
  }
  func.func @transform_3(%arg0: i32, %arg1: i32) -> (i32, i32) {
    %c0_i32 = arith.constant 0 : i32
    %c0_i32_0 = arith.constant 0 : i32
    %c0_i32_1 = arith.constant 0 : i32
    return %c0_i32, %c0_i32_0 : i32, i32
  }
  func.func @transform_4(%arg0: i32, %arg1: i32) -> (i32, i32) {
    %c0_i32 = arith.constant 0 : i32
    %c0_i32_0 = arith.constant 0 : i32
    %c0_i32_1 = arith.constant 0 : i32
    return %c0_i32, %c0_i32_0 : i32, i32
  }
  func.func @transform_5(%arg0: i32, %arg1: i32) -> (i32, i32, i32) {
    %c0_i32 = arith.constant 0 : i32
    %c0_i32_0 = arith.constant 0 : i32
    return %arg0, %c0_i32, %arg1 : i32, i32, i32
  }
}

</mosaic_0001>

<bundles_post_ra>
// kernel: tpu_custom_call.1
= control target key start
LH: loop header
LB: loop body
LE: loop exit
PB: predicated region body
PF: predicated region fallthrough
CT: control target
= control target key end

     0   :  { %10 = vsyncpa [#allocation3], 0  ;;  %s873_s0 = inlined_call_operand.vmem [shape: f32[2,4,256], index: 0, kind: input, shape index: {}]   ;;  %s874_s1 = inlined_call_operand.vmem [shape: f32[4,2], index: 1, kind: input, shape index: {}]   ;;  %s875_s2 = inlined_call_operand.vmem [shape: f32[256,64], index: 2, kind: input, shape index: {}]   ;;  %s876_s3 = inlined_call_operand.vmem [shape: f32[2,4], index: 3, kind: input, shape index: {}]   ;;  %s877_s4 = inlined_call_operand.vmem [shape: f32[2,1], index: 4, kind: input, shape index: {}]   ;;  %s878_s5 = inlined_call_operand.hbm [shape: f32[2,2,64], index: 5, kind: output, shape index: {}]  }
   0x1   :  { %12 = vsyncpa [#allocation3 + $0x1], 0  ;;  %s671_s18 = smov 0   ;;  %s673_s19 = smov 0  }
   0x2   :  { %s675_s20 = smov 0   ;;  %s677_s21 = smov 0  }
   0x3   :  { %s679_s22 = smov 0   ;;  %s681_s23 = smov 0  }
   0x4 LB: > { %s481_s24 = sadd.s32 4294967295, %s636_s23   ;;  %s482_s25 = sadd.s32 4294967294, %s636_s23   ;;  %s636_s23 = sphi %s681_s23, %s18_s23   ;;  %s632_s22 = sphi %s679_s22, %s885_s22   ;;  %s628_s21 = sphi %s677_s21, %s884_s21   ;;  %s624_s20 = sphi %s675_s20, %s883_s20   ;;  %s620_s19 = sphi %s673_s19, %s882_s19   ;;  %s616_s18 = sphi %s671_s18, %s881_s18  }
   0x5   : > { %s30_s26 = sadd.s32 1, %s632_s22  ;;  %s151_s27 = sadd.s32 1, %s624_s20 }
   0x6   : > { %p32_p0 = scmp.ge.s32.totalorder %s30_s26, 2  ;;  %p161_p1 = scmp.ne.s32.totalorder %s624_s20, %s620_s19 }
   0x7   : > { %p162_p2 = scmp.eq.s32.totalorder %s481_s24, 1  ;;  %p167_p3 = scmp.ne.s32.totalorder %s620_s19, %s616_s18 }
   0x8   : > { %s887_s26 = smov (%p32_p0, %s30_s26), 0  ;;  %p168_p5 = scmp.eq.s32.totalorder %s482_s25, 1 }
   0x9   : > { %p711_p4 = por %p162_p2, %p161_p1  ;;  %s146_s29 = ssub.s32 %s632_s22, %s887_s26 }
   0xa   : > { %p485_p6 = scmp.ge.s32.totalorder %s636_s23, 1  ;;  %p149_p7 = scmp.eq.s32.totalorder %s146_s29, 0 }
   0xb   : > { %p718_p8 = por %p168_p5, %p167_p3  ;;  %p211_p9 = scmp.lt.s32.totalorder %s636_s23, 3 }
   0xc   : > { %s724_s6 = scalar_select %p149_p7, %s624_s20, %s151_s27  }
   0xd   : > { %p212_p10 = pnand %p485_p6, %p211_p9 }
   0xe   : > { %p244_p11 = scmp.lt.s32.totalorder (!%p212_p10), %s628_s21, 1  ;;  %s240_s7 = sand.u32 (!%p212_p10), 1, %s620_s19  }
   0xf   : > { %215 = sbr.rel (%p212_p10) target bundleno = 426 (0x1aa), region = 40  ;;  %s486_s8 = sshll.u32 (!%p212_p10), %s240_s7, 1 }
  0x10   : > { %s492_s9 = sshll.u32 (!%p212_p10), %s628_s21, 1  ;;  %s391_s16 = scalar_lea.sflag (!%p212_p10), [#allocation3], %s240_s7 }
  0x11   : > { %s402_s12 = scalar_lea.hbm (!%p212_p10), %s878_s5, %s492_s9  ;;  %s578_s27 = scalar_lea.hbm (!%p212_p10), %s878_s5, 4 }
  0x12   : > { %s406_s15 = sshll.u32 (!%p212_p10), %s402_s12, 4  ;;  %s407_s15 = int_to_ptr.hbm [resolvable:$true] %s406_s15 }
  0x14   : > { %v254_v0 = vld [vmem:[%s874_s1] sm:$0xf]  ;;  %v290_v1 = vld [vmem:[%s875_s2 + $0x78] sm:$0xff]  ;;  %v638_v3 = vmov 0   ;;  %v289_v4 = vld [vmem:[%s875_s2 + $0x70] sm:$0xff]  ;;  %v639_v10 = vmov 1  }
  0x15   : > { %v306_v2 = vld [vmem:[%s875_s2 + $0xf8] sm:$0xff]  ;;  %554 = vset.pattern.permute.xlu0 %v638_v3  ;;  %313 = vmatpush.msra.mxu0 %v290_v1  ;;  %v305_v5 = vld [vmem:[%s875_s2 + $0xf0] sm:$0xff]  ;;  %v288_v6 = vld [vmem:[%s875_s2 + $0x68] sm:$0xff]  ;;  %s245_s13 = scalar_select %p244_p11, %s628_s21, 1  ;;  %v640_v35 = vmov 839922192  }
  0x16   : > { %257 = vperm.xlu0 %554, %v254_v0   ;;  %333 = vmatpush.msra.mxu1 %v306_v2  ;;  %v304_v7 = vld [vmem:[%s875_s2 + $0xe8] sm:$0xff]  ;;  %v287_v8 = vld [vmem:[%s875_s2 + $0x60] sm:$0xff]  ;;  %v286_v11 = vld [vmem:[%s875_s2 + $0x58] sm:$0xff]  ;;  %v260_v36 = vunpack.c.l.s4 %v640_v35  ;;  %vm364_vm0 = vcmask 1043456   ;;  %vm360_vm1 = vcmask 31744   ;;  %vm388_vm2 = vcmask 517120  }
  0x17   : > { %314 = vmatpush.msra.mxu0 %v289_v4  ;;  %556 = vset.pattern.permute.xlu1 %v638_v3  ;;  %v303_v9 = vld [vmem:[%s875_s2 + $0xe0] sm:$0xff]  ;;  %v302_v12 = vld [vmem:[%s875_s2 + $0xd8] sm:$0xff]  ;;  %v285_v13 = vld [vmem:[%s875_s2 + $0x50] sm:$0xff]  ;;  %s495_s14 = sshll.u32 %s245_s13, 3  ;;  %s242_s13 = scalar_lea.vmem [#allocation2], %s486_s8 }
  0x18   : > { %334 = vmatpush.msra.mxu1 %v305_v5  ;;  %v301_v14 = vld [vmem:[%s875_s2 + $0xd0] sm:$0xff]  ;;  %v284_v15 = vld [vmem:[%s875_s2 + $0x48] sm:$0xff]  ;;  %v283_v17 = vld [vmem:[%s875_s2 + $0x40] sm:$0xff]  ;;  %v261_v38 = vunpack.c.0.s8 %v260_v36  ;;  %s251_s17 = scalar_lea.vmem %s873_s0, %s495_s14  ;;  %s404_s14 = sshll.u32 %s242_s13, 4  ;;  %s405_s14 = int_to_ptr.vmem [resolvable:$true] %s404_s14 }
  0x19   : > { %315 = vmatpush.msra.mxu0 %v288_v6  ;;  %v300_v16 = vld [vmem:[%s875_s2 + $0xc8] sm:$0xff]  ;;  %v299_v18 = vld [vmem:[%s875_s2 + $0xc0] sm:$0xff]  ;;  %v282_v19 = vld [vmem:[%s875_s2 + $0x38] sm:$0xff] }
  0x1a   : > { %335 = vmatpush.msra.mxu1 %v304_v7  ;;  %v298_v20 = vld [vmem:[%s875_s2 + $0xb8] sm:$0xff]  ;;  %v281_v21 = vld [vmem:[%s875_s2 + $0x30] sm:$0xff]  ;;  %v280_v23 = vld [vmem:[%s875_s2 + $0x28] sm:$0xff] }
  0x1b   : > { %316 = vmatpush.msra.mxu0 %v287_v8  ;;  %v297_v22 = vld [vmem:[%s875_s2 + $0xb0] sm:$0xff]  ;;  %v296_v24 = vld [vmem:[%s875_s2 + $0xa8] sm:$0xff]  ;;  %v279_v25 = vld [vmem:[%s875_s2 + $0x20] sm:$0xff] }
  0x1c   : > { %336 = vmatpush.msra.mxu1 %v303_v9  ;;  %v295_v26 = vld [vmem:[%s875_s2 + $0xa0] sm:$0xff]  ;;  %v278_v27 = vld [vmem:[%s875_s2 + $0x18] sm:$0xff]  ;;  %v277_v29 = vld [vmem:[%s875_s2 + $0x10] sm:$0xff] }
  0x1d   : > { %317 = vmatpush.msra.mxu0 %v286_v11  ;;  %v294_v28 = vld [vmem:[%s875_s2 + $0x98] sm:$0xff]  ;;  %v293_v30 = vld [vmem:[%s875_s2 + $0x90] sm:$0xff]  ;;  %v276_v31 = vld [vmem:[%s875_s2 + $0x8] sm:$0xff] }
  0x1e   : > { %555 = vset.pattern.permute.xlu0 %v639_v10  ;;  %337 = vmatpush.msra.mxu1 %v302_v12  ;;  %v292_v32 = vld [vmem:[%s875_s2 + $0x88] sm:$0xff]  ;;  %v275_v33 = vld [vmem:[%s875_s2] sm:$0xff] }
  0x1f   : > { %266 = vperm.xlu0 %555, %v254_v0   ;;  %318 = vmatpush.msra.mxu0 %v285_v13  ;;  %v291_v34 = vld [vmem:[%s875_s2 + $0x80] sm:$0xff] }
  0x20   : > { %338 = vmatpush.msra.mxu1 %v301_v14  ;;  %v253_v40 = vld [vmem:[%s251_s17] sm:$0xff]  ;;  %s572_s17 = sshra.s32 %s407_s15, 4  ;;  %s573_s17 = int_to_ptr.hbm [resolvable:$true] %s572_s17 }
  0x21   : > { %319 = vmatpush.msra.mxu0 %v284_v15  ;;  %v354_v48 = vld [vmem:[%s877_s4] sm:$0x3]  ;;  %s574_s24 = scalar_lea.hbm %s573_s17, 2  ;;  %p579_p1 = scmp.lt.s32.totalorder %s573_s17, %s878_s5 }
  0x22   : > { %339 = vmatpush.msra.mxu1 %v300_v16  ;;  %357 = vperm.xlu1 %556, %v354_v48   ;;  %v353_v52 = vld [vmem:[%s876_s3] sm:$0x3]  ;;  %p575_p12 = scmp.ne.s32.totalorder %s573_s17, %s574_s24  ;;  %p580_p2 = scmp.lt.s32.totalorder %s578_s27, %s574_s24 }
  0x23   : > { %320 = vmatpush.msra.mxu0 %v283_v17 }
  0x24   : > { %340 = vmatpush.msra.mxu1 %v299_v18  ;;  %p576_p13 = pnand %p575_p12, %p711_p4  ;;  %p581_p3 = por %p580_p2, %p579_p1 }
  0x25   : > { %321 = vmatpush.msra.mxu0 %v282_v19 }
  0x26   : > { %341 = vmatpush.msra.mxu1 %v298_v20  ;;  %p577_p0 = pneg %p576_p13 }
  0x27   : > { %557 = vset.pattern.permute.xlu0 %v638_v3  ;;  %322 = vmatpush.msra.mxu0 %v281_v21 }
  0x28   : > { %342 = vmatpush.msra.mxu1 %v297_v22  ;;  %p582_p5 = pnand %p581_p3, %p577_p0 }
  0x29   : > { %323 = vmatpush.msra.mxu0 %v280_v23 }
  0x2a   : > { %343 = vmatpush.msra.mxu1 %v296_v24 }
  0x2b   : > { %324 = vmatpush.msra.mxu0 %v279_v25 }
  0x2c   : > { %344 = vmatpush.msra.mxu1 %v295_v26 }
  0x2d   : > { %325 = vmatpush.msra.mxu0 %v278_v27 }
  0x2e   : > { %345 = vmatpush.msra.mxu1 %v294_v28 }
  0x2f   : > { %326 = vmatpush.msra.mxu0 %v277_v29 }
  0x30   : > { %346 = vmatpush.msra.mxu1 %v293_v30 }
  0x31   : > { %327 = vmatpush.msra.mxu0 %v276_v31 }
  0x32   : > { %347 = vmatpush.msra.mxu1 %v292_v32 }
  0x33   : > { %328 = vmatpush.msra.mxu0 %v275_v33 }
  0x34   : > { %348 = vmatpush.msra.mxu1 %v291_v34 }
  0x88   : > { %v258_v37 = vpop.permute.xlu0 %257 }
  0x89   : > { %v262_v39 = vperm.slane %v258_v37, %v261_v38 }
  0x8b   : > { %v264_v42 = vmul.f32 %v262_v39, %v253_v40 }
  0x91   : > { %v267_v41 = vpop.permute.xlu0 %266 }
  0x92   : > { %v271_v43 = vperm.slane %v267_v41, %v261_v38 }
  0x94   : > { %v273_v44 = vadd.f32 %v271_v43, %v264_v42  ;;  %v358_v53 = vpop.permute.xlu1 %357 }
  0x96   : > { %v274_v45 = vmax.f32 %v273_v44, 0.0 }
  0x98   : > { %308 = vst [vmem:[#allocation1] ss:$2 sm:$0xff] %v274_v45 }
  0x9f   : > { %v309_v46 = vld.sshfl [vmem:[#allocation1] sm:$0xff pattern:$0x75316420]  ;;  %v310_v47 = vld.sshfl [vmem:[#allocation1 + $0x8] sm:$0xff pattern:$0x75316420] }
  0xa0   : > { %329 = vmatmul.f32.vlgmr.msra.gmra.mxu0 %v309_v46  ;;  %349 = vmatmul.f32.vlgmr.msra.gmra.mxu1 %v310_v47 }
 0x11d   : > { %v330_v49 = vpop.f32.mrf.mxu0  ;;  %v350_v50 = vpop.f32.mrf.mxu1 }
 0x11e   : > { %v351_v51 = vadd.f32 %v350_v50, %v330_v49 }
 0x120   : > { %489 = vmatpush.msk.msra.mxu2 %vm364_vm0, %v351_v51 }
 0x121   : > { %490 = vmatmul.msk.f32.vlgmr.msra.gmra.mxu2 %vm360_vm1, %v353_v52 }
 0x1a4   : > { %v385_v54 = vpop.f32.mrf.mxu2 }
 0x1a5   : > { %v386_v55 = vadd.f32 %v385_v54, %v358_v53 }
 0x1a7   : > { %389 = vst.msk [vmem:[%s242_s13] sm:$0x3] %vm388_vm2, %v386_v55 }
 0x1a8   : > { %585 = shalt.err (!%p582_p5)
}
 0x1a9   : > { %496 = dma.vmem_to_hbm [thread:$0]  (%p711_p4), %s405_s14, 32, %s407_s15, %s391_s16  }
 0x1aa PF: > { %p502_p6 = scmp.ge.s32.totalorder %s636_s23, 2  ;;  %s418_s7 = sand.u32 1, %s616_s18  }
 0x1ab   : > { %s419_s9 = scalar_lea.sflag [#allocation3], %s418_s7 }
 0x1ac   : > { %p499_p7 = pnand %p502_p6, %p718_p8 }
 0x1ae   : > { %p500_p9 = pneg %p499_p7 }
 0x1b0   : > { %611 = dma.done.wait (%p500_p9), %s419_s9, 32  }
 0x1b1   : > { %613 = vsyncadd (%p500_p9), %s419_s9, 4294967264  ;;  %s18_s23 = sadd.s32 1, %s636_s23   ;;  %s881_s18 = smov %s620_s19 }
 0x1b2   : > { %p15_p10 = scmp.ge.s32.totalorder %s18_s23, 4   ;;  %s882_s19 = smov %s624_s20 }
 0x1b3   : > { %s883_s20 = smov %s724_s6  ;;  %s884_s21 = smov %s632_s22 }
 0x1b4   : > { %s885_s22 = smov %s887_s26  ;;  %17 = sbr.rel (!%p15_p10) target bundleno = 4 (0x4), region = 75 }
 0x1b9   :  { %425 = vsyncpa [#allocation3], 1 }
 0x1ba   :  { %427 = vsyncpa [#allocation3 + $0x1], 1 }

</bundles_post_ra>
